<compile_context>
chip_gen: v7x
topology: tpu7x:2x2x1
jax: 0.10.0
libtpu: 0.0.40
codegen_flags: <defaults>
</compile_context>

<pallas_src>
import functools
import math

import jax
import jax.numpy as jnp
from jax import lax
from jax.experimental import pallas as pl
from jax.experimental.pallas import tpu as pltpu


# --------------------------------------------------------------- budgets / geometry


@functools.lru_cache(maxsize=None)
def _budgets():
    """(vmem_limit_bytes, per_tile_target_bytes, fused_resident_budget_bytes)."""
    try:
        vmem_cap = int(pltpu.get_tpu_info().vmem_capacity_bytes)
    except Exception:
        vmem_cap = 64 * 1024 * 1024          # conservative default: v7x per-TC VMEM
    vmem_cap = max(vmem_cap, 32 * 1024 * 1024)
    vmem_limit = min((vmem_cap * 3) // 4, 100 * 1024 * 1024)  # ~96 MiB v5e/v6e, ~48 MiB v7x
    tile_target = vmem_cap // 10                              # ~12.8 MiB / ~6.4 MiB
    resident_budget = vmem_cap // 3                           # ~42 MiB / ~21 MiB
    return vmem_limit, tile_target, resident_budget


def _sublane_granularity(dtype):
    # sublane packing: 8 rows/vreg for 4-byte, 16 for 2-byte, 32 for 1-byte dtypes
    return {4: 8, 2: 16, 1: 32}.get(jnp.dtype(dtype).itemsize, 8)


def _channel_block_candidates(C, g):
    if C % g != 0:
        return [C]                           # full-C blocks are always layout-legal
    return [d for d in range(g, C + 1, g) if C % d == 0]


def _pick_fused_c_block(B, C, S, dtype, resident_budget):
    itemsize = jnp.dtype(dtype).itemsize
    g = _sublane_granularity(dtype)

    def need(cb):
        col = B * cb * S
        # 2 in + 2 out pipeline buffers (x.dtype) + ~3 f32 (cb, S) slices from the B-loop
        return 4 * col * itemsize + 3 * cb * S * 4

    fitting = [cb for cb in _channel_block_candidates(C, g) if need(cb) <= resident_budget]
    if not fitting:
        return None
    # prefer an even number (>= 2) of channel blocks so the megacore 'parallel' axis
    # splits evenly across both v7x TensorCores
    good = [cb for cb in fitting if (C // cb) >= 2 and (C // cb) % 2 == 0]
    return (good or fitting)[-1]


def _pick_tiled_blocks(B, C, S, dtype, tile_target, vmem_limit):
    itemsize = jnp.dtype(dtype).itemsize
    g = _sublane_granularity(dtype)
    cands = _channel_block_candidates(C, g)
    good = [cb for cb in cands if (C // cb) >= 2 and (C // cb) % 2 == 0]
    pool = good if good else cands
    budget = int(vmem_limit * 0.85)

    def need(cb, sb):
        tile = B * cb * sb * itemsize        # one x / y tile (heavier normalize pass)
        return 4 * tile + 2 * cb * sb * 4 + (1 << 16)

    # smallest channel block whose full-spatial column already reaches the per-tile
    # byte target (keeps the 'parallel' channel axis as wide as possible)
    c_blk = pool[-1]
    for cb in pool:
        if B * cb * S * itemsize >= tile_target:
            c_blk = cb
            break
    idx = pool.index(c_blk)
    while idx > 0 and need(c_blk, min(S, 128)) > budget:
        idx -= 1
        c_blk = pool[idx]
    # TODO(synk): if even the minimal (c_blk, 128) tile exceeds the VMEM budget
    # (absurdly large B) this still emits it and lets the compiler complain loudly.

    if B * c_blk * S * itemsize <= tile_target and need(c_blk, S) <= budget:
        return c_blk, S                      # full-S blocks: no ragged tail at all
    sb = (min(tile_target // max(1, B * c_blk * itemsize), S) // 128) * 128
    sb = max(sb, 128)
    while sb > 128 and need(c_blk, sb) > budget:
        sb -= 128
    if sb >= S:
        sb = S
    return c_blk, sb


def _buffered_spec(block_shape, index_map, buffers):
    """BlockSpec with deeper pipelining; falls back cleanly on older jax."""
    try:
        return pl.BlockSpec(block_shape, index_map, pipeline_mode=pl.Buffered(buffers))
    except Exception:
        return pl.BlockSpec(block_shape, index_map)


# ----------------------------------------------------------------------------- kernels


def _bn_fused_kernel(x_ref, w_ref, b_ref, y_ref, mean_ref, var_ref, *, eps, inv_count, batch):
    # x_ref / y_ref: (B, c_blk, S); w/b/mean/var refs: (1, c_blk, 1).
    # B-sliced accumulation keeps the f32 working set at ~3 (c_blk, S) slices.
    s = x_ref[0].astype(jnp.float32)
    for i in range(1, batch):
        s = s + x_ref[i].astype(jnp.float32)
    mean = jnp.sum(s, axis=-1, keepdims=True) * inv_count            # (c_blk, 1)

    d = x_ref[0].astype(jnp.float32) - mean
    m2 = d * d
    for i in range(1, batch):
        d = x_ref[i].astype(jnp.float32) - mean
        m2 = m2 + d * d
    var = jnp.sum(m2, axis=-1, keepdims=True) * inv_count            # biased variance

    inv_std = lax.rsqrt(var + eps)
    scale = w_ref[0] * inv_std
    shift = b_ref[0] - mean * scale
    for i in range(batch):
        y_ref[i] = (x_ref[i].astype(jnp.float32) * scale + shift).astype(y_ref.dtype)

    mean_ref[0] = mean
    var_ref[0] = var


def _bn_stats_kernel(x_ref, mean_ref, m2_ref, *, batch, s_blk, s_total, num_s_inner):
    # grid = (S-partitions ['parallel'], C-blocks ['parallel'], S-blocks ['arbitrary']).
    # mean_ref / m2_ref: (1, c_blk, 1) f32 blocks, resident across the inner S axis;
    # they hold this partition's running mean / raw centered M2 (Chan's combine).
    sp = pl.program_id(0)
    si = pl.program_id(2)
    gsi = sp * num_s_inner + si                                      # global S-block index

    # mask for the (possibly ragged) globally-last spatial block
    lane = lax.broadcasted_iota(jnp.int32, (1, s_blk), 1)
    valid = (gsi * s_blk + lane) < s_total                           # (1, s_blk)
    n_valid = jnp.minimum(s_blk, s_total - gsi * s_blk).astype(jnp.float32)
    t_cnt = n_valid * batch

    t_sum = jnp.where(valid, x_ref[0].astype(jnp.float32), 0.0)
    for i in range(1, batch):
        t_sum = t_sum + jnp.where(valid, x_ref[i].astype(jnp.float32), 0.0)
    t_mean = jnp.sum(t_sum, axis=-1, keepdims=True) / t_cnt          # (c_blk, 1)

    d = jnp.where(valid, x_ref[0].astype(jnp.float32) - t_mean, 0.0)
    m2s = d * d
    for i in range(1, batch):
        d = jnp.where(valid, x_ref[i].astype(jnp.float32) - t_mean, 0.0)
        m2s = m2s + d * d
    t_m2 = jnp.sum(m2s, axis=-1, keepdims=True)                      # (c_blk, 1)

    @pl.when(si == 0)
    def _():
        mean_ref[...] = jnp.zeros_like(mean_ref)
        m2_ref[...] = jnp.zeros_like(m2_ref)

    # Chan's parallel combine; every earlier tile of this partition is full (only the
    # globally-last tile can be ragged), so n_a = si * batch * s_blk.
    n_a = si.astype(jnp.float32) * (batch * s_blk)
    n_ab = n_a + t_cnt
    prev_mean = mean_ref[0]
    delta = t_mean - prev_mean
    mean_ref[0] = prev_mean + delta * (t_cnt / n_ab)
    m2_ref[0] = m2_ref[0] + t_m2 + (delta * delta) * (n_a * t_cnt / n_ab)


def _bn_normalize_kernel(x_ref, mean_ref, var_ref, w_ref, b_ref, y_ref, *, eps, batch):
    inv_std = lax.rsqrt(var_ref[0] + eps)                            # (c_blk, 1)
    scale = w_ref[0] * inv_std
    shift = b_ref[0] - mean_ref[0] * scale
    for i in range(batch):
        y_ref[i] = (x_ref[i].astype(jnp.float32) * scale + shift).astype(y_ref.dtype)
    # NOTE: a ragged last S block reads padding garbage but its out-of-bounds portion
    # is never written back, so no masking is needed here.


# --------------------------------------------------------------------------- wrapper


def batchnorm_forward(x, weight, bias, running_mean, running_var,
                      eps=1e-5, momentum=0.1, *,
                      force_two_pass=False, block_s=None):
    """Training-mode BatchNorm forward for channel-first input (B, C, *spatial).

    Matches the PyTorch module with training=True, affine=True, track_running_stats=True
    and a float momentum. Returns (y, new_running_mean, new_running_var); y has x.dtype.
    # TODO(synk): eval-mode (normalize with running stats), affine=False, momentum=None
    # (cumulative average via num_batches_tracked) and PyTorch's N==1 error are not
    # implemented in-kernel; they are trivial JAX glue around the same kernels.
    """
    B, C = x.shape[0], x.shape[1]
    S = int(math.prod(x.shape[2:]))
    N = B * S
    itemsize = jnp.dtype(x.dtype).itemsize
    vmem_limit, tile_target, resident_budget = _budgets()

    x3 = x.reshape(B, C, S)                       # free view: no transpose, no copy
    w3 = weight.reshape(1, C, 1).astype(jnp.float32)
    b3 = bias.reshape(1, C, 1).astype(jnp.float32)

    def cparams(dims):
        return pltpu.CompilerParams(dimension_semantics=dims,
                                    vmem_limit_bytes=vmem_limit)

    fused_c_blk = None if force_two_pass else _pick_fused_c_block(
        B, C, S, x.dtype, resident_budget)

    if fused_c_blk is not None:
        # ---- single pass: 1 HBM read + 1 HBM write of x ----
        c_blk = fused_c_blk
        num_c = C // c_blk
        y3, mean3, var3 = pl.pallas_call(
            functools.partial(_bn_fused_kernel, eps=eps, inv_count=1.0 / N, batch=B),
            out_shape=(
                jax.ShapeDtypeStruct((B, C, S), x.dtype),
                jax.ShapeDtypeStruct((1, C, 1), jnp.float32),
                jax.ShapeDtypeStruct((1, C, 1), jnp.float32),
            ),
            grid=(num_c,),
            in_specs=[
                pl.BlockSpec((B, c_blk, S), lambda ci: (0, ci, 0)),
                pl.BlockSpec((1, c_blk, 1), lambda ci: (0, ci, 0)),
                pl.BlockSpec((1, c_blk, 1), lambda ci: (0, ci, 0)),
            ],
            out_specs=(
                pl.BlockSpec((B, c_blk, S), lambda ci: (0, ci, 0)),
                pl.BlockSpec((1, c_blk, 1), lambda ci: (0, ci, 0)),
                pl.BlockSpec((1, c_blk, 1), lambda ci: (0, ci, 0)),
            ),
            compiler_params=cparams(("parallel",)),
            cost_estimate=pl.CostEstimate(flops=5 * N * C, transcendentals=C,
                                          bytes_accessed=2 * N * C * itemsize),
        )(x3, w3, b3)
        mean_c = mean3.reshape(C)
        var_c = var3.reshape(C)
    else:
        # ---- two passes: 2 HBM reads + 1 HBM write of x ----
        c_blk, s_blk = _pick_tiled_blocks(B, C, S, x.dtype, tile_target, vmem_limit)
        if block_s is not None:
            assert block_s == S or block_s % 128 == 0, "block_s must be S or a multiple of 128"
            s_blk = block_s
        num_c = C // c_blk
        num_sb = -(-S // s_blk)                   # ceil-div; ragged tail is masked in-kernel

        # If the channel axis alone gives < 2 parallel blocks, partition the spatial
        # reduction as well so both TensorCores get work; per-partition partial stats
        # are combined with Chan's formula in the tiny JAX epilogue below.
        num_sp = 1
        if num_c < 2:
            for p in (4, 2):
                if num_sb % p == 0:
                    num_sp = p
                    break
        num_si = num_sb // num_sp

        mean_p, m2_p = pl.pallas_call(
            functools.partial(_bn_stats_kernel, batch=B, s_blk=s_blk,
                              s_total=S, num_s_inner=num_si),
            out_shape=(
                jax.ShapeDtypeStruct((num_sp, C, 1), jnp.float32),
                jax.ShapeDtypeStruct((num_sp, C, 1), jnp.float32),
            ),
            grid=(num_sp, num_c, num_si),
            in_specs=[_buffered_spec((B, c_blk, s_blk),
                                     lambda sp, ci, si: (0, ci, sp * num_si + si), 3)],
            out_specs=(
                pl.BlockSpec((1, c_blk, 1), lambda sp, ci, si: (sp, ci, 0)),
                pl.BlockSpec((1, c_blk, 1), lambda sp, ci, si: (sp, ci, 0)),
            ),
            compiler_params=cparams(("parallel", "parallel", "arbitrary")),
            cost_estimate=pl.CostEstimate(flops=4 * N * C, transcendentals=0,
                                          bytes_accessed=N * C * itemsize),
        )(x3)

        # Chan combine across spatial partitions (tiny (C,)-vector math in JAX).
        mean_p = mean_p.reshape(num_sp, C)
        m2_p = m2_p.reshape(num_sp, C)
        mean_c = mean_p[0]
        m2_c = m2_p[0]
        n_a = float(B * min(S, num_si * s_blk))
        for p in range(1, num_sp):
            lo = p * num_si * s_blk
            n_b = float(B * (min(S, lo + num_si * s_blk) - lo))
            n_ab = n_a + n_b
            delta = mean_p[p] - mean_c
            mean_c = mean_c + delta * (n_b / n_ab)
            m2_c = m2_c + m2_p[p] + delta * delta * (n_a * n_b / n_ab)
            n_a = n_ab
        var_c = m2_c / N                           # biased variance

        mean3 = mean_c.reshape(1, C, 1)
        var3 = var_c.reshape(1, C, 1)

        y3 = pl.pallas_call(
            functools.partial(_bn_normalize_kernel, eps=eps, batch=B),
            out_shape=jax.ShapeDtypeStruct((B, C, S), x.dtype),
            grid=(num_c, num_sb),
            in_specs=[
                pl.BlockSpec((B, c_blk, s_blk), lambda ci, si: (0, ci, si)),
                pl.BlockSpec((1, c_blk, 1), lambda ci, si: (0, ci, 0)),
                pl.BlockSpec((1, c_blk, 1), lambda ci, si: (0, ci, 0)),
                pl.BlockSpec((1, c_blk, 1), lambda ci, si: (0, ci, 0)),
                pl.BlockSpec((1, c_blk, 1), lambda ci, si: (0, ci, 0)),
            ],
            out_specs=pl.BlockSpec((B, c_blk, s_blk), lambda ci, si: (0, ci, si)),
            compiler_params=cparams(("parallel", "parallel")),
            cost_estimate=pl.CostEstimate(flops=2 * N * C, transcendentals=C,
                                          bytes_accessed=2 * N * C * itemsize),
        )(x3, mean3, var3, w3, b3)

    y = y3.reshape(x.shape)

    # Running-stat EMA (PyTorch uses the UNBIASED variance for running_var).
    bessel = N / (N - 1) if N > 1 else 1.0         # TODO(synk): PyTorch raises when N == 1
    var_unbiased = var_c * bessel
    new_rm = momentum * mean_c + (1.0 - momentum) * running_mean
    new_rv = momentum * var_unbiased + (1.0 - momentum) * running_var
    return y, new_rm, new_rv


# ------------------------------------------------------------------------- reference


def _reference(x, weight, bias, eps):
    xf = x.astype(jnp.float32)
    red = (0,) + tuple(range(2, x.ndim))
    mean = jnp.mean(xf, axis=red, keepdims=True)
    var = jnp.mean((xf - mean) ** 2, axis=red, keepdims=True)
    shape = (1, x.shape[1]) + (1,) * (x.ndim - 2)
    y = ((xf - mean) * lax.rsqrt(var + eps) * weight.reshape(shape)
         + bias.reshape(shape)).astype(x.dtype)
    return y, mean.reshape(-1), var.reshape(-1)


def _check(x, weight, bias, eps, momentum, atol, rtol, stat_atol, **kw):
    C = x.shape[1]
    rm0 = jnp.zeros((C,), jnp.float32)
    rv0 = jnp.ones((C,), jnp.float32)
    N = x.shape[0] * int(math.prod(x.shape[2:]))
    y_ref, mean_r, var_r = _reference(x, weight, bias, eps)
    rm_ref = momentum * mean_r + (1.0 - momentum) * rm0
    rv_ref = momentum * (var_r * N / (N - 1)) + (1.0 - momentum) * rv0

    y, rm, rv = batchnorm_forward(x, weight, bias, rm0, rv0,
                                  eps=eps, momentum=momentum, **kw)
    y = jax.block_until_ready(y)
    jax.block_until_ready(rm)
    jax.block_until_ready(rv)
    assert y.shape == x.shape and y.dtype == x.dtype
    yf, yrf = y.astype(jnp.float32), y_ref.astype(jnp.float32)
    err = float(jnp.max(jnp.abs(yf - yrf)))
    assert jnp.allclose(yf, yrf, atol=atol, rtol=rtol), err
    assert jnp.allclose(rm, rm_ref, atol=stat_atol, rtol=stat_atol)
    assert jnp.allclose(rv, rv_ref, atol=stat_atol, rtol=stat_atol)


if __name__ == "__main__":
    key = jax.random.PRNGKey(0)
    eps, momentum = 1e-5, 0.1
    k1, k2, k3, k4, k5 = jax.random.split(key, 5)

    # Primary shape: BatchNorm2d (dims=2), fused single-pass path.
    B, C, H, W = 2, 4, 16, 16
    x = jax.random.normal(k1, (B, C, H, W), jnp.float32) * 1.7 + 2.5
    w = 1.0 + 0.5 * jax.random.normal(k2, (C,), jnp.float32)
    b = 0.3 * jax.random.normal(k3, (C,), jnp.float32)
    _check(x, w, b, eps, momentum, atol=1e-4, rtol=1e-4, stat_atol=1e-4)

    # Same shape forced onto the tiled two-pass path (exercises the spatial-partition
    # parallel stats + Chan combine, since C=4 gives only one channel block).
    _check(x, w, b, eps, momentum, atol=1e-4, rtol=1e-4, stat_atol=1e-4,
           force_two_pass=True, block_s=128)

    # Ragged spatial tail: S = 10*13 = 130 with 128-wide blocks (masked in-kernel).
    x_r = jax.random.normal(k4, (2, 8, 10, 13), jnp.float32) * 0.8 - 1.2
    w_r = 1.0 + 0.5 * jax.random.normal(k2, (8,), jnp.float32)
    b_r = 0.3 * jax.random.normal(k3, (8,), jnp.float32)
    _check(x_r, w_r, b_r, eps, momentum, atol=1e-4, rtol=1e-4, stat_atol=1e-4,
           force_two_pass=True, block_s=128)

    # bf16 input, fused path with dtype-aware (16-row) channel blocks -> 2 parallel blocks.
    x_h = (jax.random.normal(k5, (2, 32, 16, 16), jnp.float32) * 1.3 + 0.7).astype(jnp.bfloat16)
    w_h = 1.0 + 0.5 * jax.random.normal(k2, (32,), jnp.float32)
    b_h = 0.3 * jax.random.normal(k3, (32,), jnp.float32)
    _check(x_h, w_h, b_h, eps, momentum, atol=3e-2, rtol=2e-2, stat_atol=1e-3)

    print("KERNEL_OK")
</pallas_src>

<mosaic_0001>
module attributes {stable_mosaic.version = 11 : i64} {
  func.func @_bn_fused_kernel(%arg0: i32, %arg1: memref<2x4x256xf32, #tpu.memory_space<vmem>>, %arg2: memref<1x4x1xf32, #tpu.memory_space<vmem>>, %arg3: memref<1x4x1xf32, #tpu.memory_space<vmem>>, %arg4: memref<2x4x256xf32, #tpu.memory_space<vmem>>, %arg5: memref<1x4x1xf32, #tpu.memory_space<vmem>>, %arg6: memref<1x4x1xf32, #tpu.memory_space<vmem>>) attributes {dimension_semantics = [#tpu.dimension_semantics<parallel>], iteration_bounds = array<i64: 1>, scalar_prefetch = 0 : i64, scratch_operands = 0 : i64, tpu.core_type = #tpu.core_type<tc>, window_params = [{transform_indices = @transform_0, window_bounds = array<i64: 2, 4, 256>}, {transform_indices = @transform_1, window_bounds = array<i64: 1, 4, 1>}, {transform_indices = @transform_2, window_bounds = array<i64: 1, 4, 1>}, {transform_indices = @transform_3, window_bounds = array<i64: 2, 4, 256>}, {transform_indices = @transform_4, window_bounds = array<i64: 1, 4, 1>}, {transform_indices = @transform_5, window_bounds = array<i64: 1, 4, 1>}]} {
    %c0 = arith.constant 0 : index
    %c0_0 = arith.constant 0 : index
    %c0_1 = arith.constant 0 : index
    %0 = vector.load %arg1[%c0, %c0_0, %c0_1] : memref<2x4x256xf32, #tpu.memory_space<vmem>>, vector<1x4x256xf32>
    %1 = vector.shape_cast %0 : vector<1x4x256xf32> to vector<4x256xf32>
    %c1 = arith.constant 1 : index
    %c0_2 = arith.constant 0 : index
    %c0_3 = arith.constant 0 : index
    %2 = vector.load %arg1[%c1, %c0_2, %c0_3] : memref<2x4x256xf32, #tpu.memory_space<vmem>>, vector<1x4x256xf32>
    %3 = vector.shape_cast %2 : vector<1x4x256xf32> to vector<4x256xf32>
    %4 = arith.addf %1, %3 : vector<4x256xf32>
    %cst = arith.constant dense<0.000000e+00> : vector<4xf32>
    %5 = vector.multi_reduction <add>, %4, %cst [1] : vector<4x256xf32> to vector<4xf32>
    %6 = vector.shape_cast %5 : vector<4xf32> to vector<4x1xf32>
    %cst_4 = arith.constant 0.001953125 : f32
    %7 = vector.broadcast %cst_4 : f32 to vector<4x1xf32>
    %8 = arith.mulf %6, %7 : vector<4x1xf32>
    %c0_5 = arith.constant 0 : index
    %c0_6 = arith.constant 0 : index
    %c0_7 = arith.constant 0 : index
    %9 = vector.load %arg1[%c0_5, %c0_6, %c0_7] : memref<2x4x256xf32, #tpu.memory_space<vmem>>, vector<1x4x256xf32>
    %10 = vector.shape_cast %9 : vector<1x4x256xf32> to vector<4x256xf32>
    %11 = vector.broadcast %8 : vector<4x1xf32> to vector<4x256xf32>
    %12 = arith.subf %10, %11 : vector<4x256xf32>
    %13 = arith.mulf %12, %12 : vector<4x256xf32>
    %c1_8 = arith.constant 1 : index
    %c0_9 = arith.constant 0 : index
    %c0_10 = arith.constant 0 : index
    %14 = vector.load %arg1[%c1_8, %c0_9, %c0_10] : memref<2x4x256xf32, #tpu.memory_space<vmem>>, vector<1x4x256xf32>
    %15 = vector.shape_cast %14 : vector<1x4x256xf32> to vector<4x256xf32>
    %16 = vector.broadcast %8 : vector<4x1xf32> to vector<4x256xf32>
    %17 = arith.subf %15, %16 : vector<4x256xf32>
    %18 = arith.mulf %17, %17 : vector<4x256xf32>
    %19 = arith.addf %13, %18 : vector<4x256xf32>
    %cst_11 = arith.constant dense<0.000000e+00> : vector<4xf32>
    %20 = vector.multi_reduction <add>, %19, %cst_11 [1] : vector<4x256xf32> to vector<4xf32>
    %21 = vector.shape_cast %20 : vector<4xf32> to vector<4x1xf32>
    %cst_12 = arith.constant 0.001953125 : f32
    %22 = vector.broadcast %cst_12 : f32 to vector<4x1xf32>
    %23 = arith.mulf %21, %22 : vector<4x1xf32>
    %cst_13 = arith.constant 9.99999974E-6 : f32
    %24 = vector.broadcast %cst_13 : f32 to vector<4x1xf32>
    %25 = arith.addf %23, %24 : vector<4x1xf32>
    %26 = math.rsqrt %25 : vector<4x1xf32>
    %c0_14 = arith.constant 0 : index
    %c0_15 = arith.constant 0 : index
    %c0_16 = arith.constant 0 : index
    %27 = vector.load %arg2[%c0_14, %c0_15, %c0_16] : memref<1x4x1xf32, #tpu.memory_space<vmem>>, vector<1x4x1xf32>
    %28 = vector.shape_cast %27 : vector<1x4x1xf32> to vector<4x1xf32>
    %29 = arith.mulf %28, %26 : vector<4x1xf32>
    %c0_17 = arith.constant 0 : index
    %c0_18 = arith.constant 0 : index
    %c0_19 = arith.constant 0 : index
    %30 = vector.load %arg3[%c0_17, %c0_18, %c0_19] : memref<1x4x1xf32, #tpu.memory_space<vmem>>, vector<1x4x1xf32>
    %31 = vector.shape_cast %30 : vector<1x4x1xf32> to vector<4x1xf32>
    %32 = arith.mulf %8, %29 : vector<4x1xf32>
    %33 = arith.subf %31, %32 : vector<4x1xf32>
    %c0_20 = arith.constant 0 : index
    %c0_21 = arith.constant 0 : index
    %c0_22 = arith.constant 0 : index
    %34 = vector.load %arg1[%c0_20, %c0_21, %c0_22] : memref<2x4x256xf32, #tpu.memory_space<vmem>>, vector<1x4x256xf32>
    %35 = vector.shape_cast %34 : vector<1x4x256xf32> to vector<4x256xf32>
    %36 = vector.broadcast %29 : vector<4x1xf32> to vector<4x256xf32>
    %37 = arith.mulf %35, %36 : vector<4x256xf32>
    %38 = vector.broadcast %33 : vector<4x1xf32> to vector<4x256xf32>
    %39 = arith.addf %37, %38 : vector<4x256xf32>
    %c0_23 = arith.constant 0 : index
    %c0_24 = arith.constant 0 : index
    %c0_25 = arith.constant 0 : index
    %40 = vector.load %arg4[%c0_23, %c0_24, %c0_25] : memref<2x4x256xf32, #tpu.memory_space<vmem>>, vector<1x4x256xf32>
    %41 = vector.shape_cast %40 : vector<1x4x256xf32> to vector<4x256xf32>
    %42 = vector.shape_cast %39 : vector<4x256xf32> to vector<1x4x256xf32>
    tpu.vector_store %arg4[%c0_23, %c0_24, %c0_25], %42 {strides = array<i32>} : memref<2x4x256xf32, #tpu.memory_space<vmem>>, vector<1x4x256xf32>,
    %c1_26 = arith.constant 1 : index
    %c0_27 = arith.constant 0 : index
    %c0_28 = arith.constant 0 : index
    %43 = vector.load %arg1[%c1_26, %c0_27, %c0_28] : memref<2x4x256xf32, #tpu.memory_space<vmem>>, vector<1x4x256xf32>
    %44 = vector.shape_cast %43 : vector<1x4x256xf32> to vector<4x256xf32>
    %45 = vector.broadcast %29 : vector<4x1xf32> to vector<4x256xf32>
    %46 = arith.mulf %44, %45 : vector<4x256xf32>
    %47 = vector.broadcast %33 : vector<4x1xf32> to vector<4x256xf32>
    %48 = arith.addf %46, %47 : vector<4x256xf32>
    %c1_29 = arith.constant 1 : index
    %c0_30 = arith.constant 0 : index
    %c0_31 = arith.constant 0 : index
    %49 = vector.load %arg4[%c1_29, %c0_30, %c0_31] : memref<2x4x256xf32, #tpu.memory_space<vmem>>, vector<1x4x256xf32>
    %50 = vector.shape_cast %49 : vector<1x4x256xf32> to vector<4x256xf32>
    %51 = vector.shape_cast %48 : vector<4x256xf32> to vector<1x4x256xf32>
    tpu.vector_store %arg4[%c1_29, %c0_30, %c0_31], %51 {strides = array<i32>} : memref<2x4x256xf32, #tpu.memory_space<vmem>>, vector<1x4x256xf32>,
    %c0_32 = arith.constant 0 : index
    %c0_33 = arith.constant 0 : index
    %c0_34 = arith.constant 0 : index
    %52 = vector.load %arg5[%c0_32, %c0_33, %c0_34] : memref<1x4x1xf32, #tpu.memory_space<vmem>>, vector<1x4x1xf32>
    %53 = vector.shape_cast %52 : vector<1x4x1xf32> to vector<4x1xf32>
    %54 = vector.shape_cast %8 : vector<4x1xf32> to vector<1x4x1xf32>
    tpu.vector_store %arg5[%c0_32, %c0_33, %c0_34], %54 {strides = array<i32>} : memref<1x4x1xf32, #tpu.memory_space<vmem>>, vector<1x4x1xf32>,
    %c0_35 = arith.constant 0 : index
    %c0_36 = arith.constant 0 : index
    %c0_37 = arith.constant 0 : index
    %55 = vector.load %arg6[%c0_35, %c0_36, %c0_37] : memref<1x4x1xf32, #tpu.memory_space<vmem>>, vector<1x4x1xf32>
    %56 = vector.shape_cast %55 : vector<1x4x1xf32> to vector<4x1xf32>
    %57 = vector.shape_cast %23 : vector<4x1xf32> to vector<1x4x1xf32>
    tpu.vector_store %arg6[%c0_35, %c0_36, %c0_37], %57 {strides = array<i32>} : memref<1x4x1xf32, #tpu.memory_space<vmem>>, vector<1x4x1xf32>,
    return
  }
  func.func @transform_0(%arg0: i32) -> (i32, i32, i32) {
    %c0_i32 = arith.constant 0 : i32
    %c0_i32_0 = arith.constant 0 : i32
    %c0_i32_1 = arith.constant 0 : i32
    return %c0_i32, %arg0, %c0_i32_0 : i32, i32, i32
  }
  func.func @transform_1(%arg0: i32) -> (i32, i32, i32) {
    %c0_i32 = arith.constant 0 : i32
    %c0_i32_0 = arith.constant 0 : i32
    %c0_i32_1 = arith.constant 0 : i32
    return %c0_i32, %arg0, %c0_i32_0 : i32, i32, i32
  }
  func.func @transform_2(%arg0: i32) -> (i32, i32, i32) {
    %c0_i32 = arith.constant 0 : i32
    %c0_i32_0 = arith.constant 0 : i32
    %c0_i32_1 = arith.constant 0 : i32
    return %c0_i32, %arg0, %c0_i32_0 : i32, i32, i32
  }
  func.func @transform_3(%arg0: i32) -> (i32, i32, i32) {
    %c0_i32 = arith.constant 0 : i32
    %c0_i32_0 = arith.constant 0 : i32
    %c0_i32_1 = arith.constant 0 : i32
    return %c0_i32, %arg0, %c0_i32_0 : i32, i32, i32
  }
  func.func @transform_4(%arg0: i32) -> (i32, i32, i32) {
    %c0_i32 = arith.constant 0 : i32
    %c0_i32_0 = arith.constant 0 : i32
    %c0_i32_1 = arith.constant 0 : i32
    return %c0_i32, %arg0, %c0_i32_0 : i32, i32, i32
  }
  func.func @transform_5(%arg0: i32) -> (i32, i32, i32) {
    %c0_i32 = arith.constant 0 : i32
    %c0_i32_0 = arith.constant 0 : i32
    %c0_i32_1 = arith.constant 0 : i32
    return %c0_i32, %arg0, %c0_i32_0 : i32, i32, i32
  }
}

</mosaic_0001>

<bundles_post_ra>
// kernel: tpu_custom_call.1
= control target key start
LH: loop header
LB: loop body
LE: loop exit
PB: predicated region body
PF: predicated region fallthrough
CT: control target
= control target key end

     0   :  { %11 = vsyncpa [#allocation3], 0  ;;  %s278_s0 = inlined_call_operand.hbm [shape: f32[2,4,256], index: 0, kind: input, shape index: {}]   ;;  %s279_s1 = inlined_call_operand.vmem [shape: f32[1,4,1], index: 1, kind: input, shape index: {}]   ;;  %s280_s2 = inlined_call_operand.vmem [shape: f32[1,4,1], index: 2, kind: input, shape index: {}]   ;;  %s281_s3 = inlined_call_operand.hbm [shape: f32[2,4,256], index: 3, kind: output, shape index: {0}]   ;;  %s282_s4 = inlined_call_operand.vmem [shape: f32[1,4,1], index: 4, kind: output, shape index: {1}]   ;;  %s283_s5 = inlined_call_operand.vmem [shape: f32[1,4,1], index: 5, kind: output, shape index: {2}]  }
   0x1   :  { %12 = vsyncpa [#allocation4], 0  ;;  %s194_s18 = smov [#allocation2]   ;;  %s146_s22 = scalar_lea.hbm %s278_s0, 256 }
   0x2   :  { %s18_s19 = sshll.u32 %s194_s18, 4  ;;  %p147_p0 = scmp.ne.s32.totalorder %s278_s0, %s146_s22  ;;  %s19_s19 = int_to_ptr.vmem [resolvable:$true] %s18_s19 }
   0x3   :  { %p150_p1 = scmp.lt.u32.totalorder %s146_s22, %s278_s0 }
   0x5   :  { %p152_p2 = pnand %p150_p1, %p147_p0 }
   0x7   :  { %155 = shalt.err (!%p152_p2)
}
   0x8   :  { %s156_s27 = scalar_lea.vmem %s19_s19, 256  ;;  %p161_p4 = scmp.lt.s32.totalorder %s19_s19, %s19_s19 }
   0x9   :  { %p157_p3 = scmp.ne.s32.totalorder %s19_s19, %s156_s27  ;;  %p162_p5 = scmp.lt.s32.totalorder %s156_s27, %s156_s27 }
   0xb   :  { %p163_p6 = por %p162_p5, %p161_p4 }
   0xd   :  { %p164_p7 = pnand %p163_p6, %p157_p3 }
   0xf   :  { %167 = shalt.err (!%p164_p7)
}
  0x10   :  { %s195_s28 = smov 128   ;;  %s196_s29 = smov 8  }
  0x11   :  { %24 = dma.hbm_to_vmem [thread:$0]  %s278_s0, 256, %s19_s19, [#allocation3], %s195_s28, %s195_s28, %s196_s29  }
  0x12   :  { %190 = dma.done.wait [#allocation3], 256  }
  0x13   :  { %191 = vsyncadd [#allocation3], 4294967040  ;;  %v32_v0 = vld [vmem:[#allocation2] sm:$0xff]  ;;  %v34_v1 = vld [vmem:[#allocation2 + $0x8] sm:$0xff]  ;;  %vm39_vm0 = vcmask 1043456   ;;  %v50_v9 = vlaneseq  ;;  %vm108_vm1 = vcmask 3072  }
  0x14   :  { %v35_v2 = vadd.f32 %v34_v1, %v32_v0  ;;  %v197_v7 = vmov 839922192   ;;  %v198_v25 = vmov 0   ;;  %v71_v29 = vld [vmem:[%s279_s1] sm:$0xf]  ;;  %s199_s13 = smov [#allocation5]  }
  0x15   :  { %v48_v8 = vunpack.c.l.s4 %v197_v7  ;;  %v51_v11 = vshrl.u32 %v50_v9, 7  ;;  %142 = vset.pattern.permute.xlu1 %v198_v25  ;;  %143 = vset.pattern.permute.xlu0 %v198_v25  ;;  %v73_v32 = vld [vmem:[%s280_s2] sm:$0xf] }
  0x16   :  { %v37_v3 = vcombine.high %v35_v2, %v35_v2  ;;  %v40_v4 = vsel %vm39_vm0, %v35_v2, 0.0 }
  0x17   :  { %v49_v10 = vunpack.c.0.s8 %v48_v8 }
  0x18   :  { %v41_v5 = vsel %vm39_vm0, %v37_v3, 0.0 }
  0x19   :  { %v42_v6 = vadd.f32 %v41_v5, %v40_v4  ;;  %v52_v12 = vsub.s32 %v49_v10, %v51_v11 }
  0x1b   :  { %43 = vadd.xlane.f32.xlu0 %v42_v6 }
  0xa8   :  { %v44_v13 = vpop.xlane.xlu0 %43 }
  0xa9   :  { %v45_v14 = vmul.f32 0.001953125, %v44_v13 }
  0xab   :  { %v53_v15 = vrot.slane %v45_v14, %v52_v12  ;;  %109 = vst.msk [vmem:[%s282_s4] sm:$0xf] %vm108_vm1, %v45_v14 }
  0xad   :  { %v55_v16 = vsub.f32 %v32_v0, %v53_v15  ;;  %v57_v17 = vsub.f32 %v34_v1, %v53_v15 }
  0xaf   :  { %v56_v18 = vmul.f32 %v55_v16, %v55_v16  ;;  %v58_v19 = vmul.f32 %v57_v17, %v57_v17 }
  0xb1   :  { %v59_v20 = vadd.f32 %v58_v19, %v56_v18 }
  0xb3   :  { %v61_v21 = vcombine.high %v59_v20, %v59_v20  ;;  %v63_v22 = vsel %vm39_vm0, %v59_v20, 0.0 }
  0xb5   :  { %v64_v23 = vsel %vm39_vm0, %v61_v21, 0.0 }
  0xb6   :  { %v65_v24 = vadd.f32 %v64_v23, %v63_v22 }
  0xb8   :  { %66 = vadd.xlane.f32.xlu0 %v65_v24 }
 0x145   :  { %v67_v26 = vpop.xlane.xlu0 %66 }
 0x146   :  { %v68_v27 = vmul.f32 0.001953125, %v67_v26 }
 0x148   :  { %v69_v28 = vadd.f32 1e-05, %v68_v27  ;;  %110 = vst.msk [vmem:[%s283_s5] sm:$0xf] %vm108_vm1, %v68_v27  ;;  %s116_s5 = sshll.u32 %s199_s13, 4  ;;  %s117_s5 = int_to_ptr.vmem [resolvable:$true] %s116_s5 }
 0x149   :  { %s168_s1 = scalar_lea.vmem %s117_s5, 256  ;;  %p173_p9 = scmp.lt.s32.totalorder %s117_s5, %s117_s5 }
 0x14a   :  { %144 = vrsqrt.f32 %v69_v28  ;;  %p169_p8 = scmp.ne.s32.totalorder %s117_s5, %s168_s1  ;;  %p174_p10 = scmp.lt.s32.totalorder %s168_s1, %s168_s1 }
 0x14c   :  { %p175_p11 = por %p174_p10, %p173_p9 }
 0x14e   :  { %p176_p12 = pnand %p175_p11, %p169_p8 }
 0x154   :  { %v145_v30 = vpop.eup %144 }
 0x155   :  { %v72_v31 = vmul.f32 %v145_v30, %v71_v29 }
 0x157   :  { %78 = vperm.xlu1 %142, %v72_v31   ;;  %v74_v33 = vmul.f32 %v72_v31, %v45_v14 }
 0x159   :  { %v75_v34 = vsub.f32 %v73_v32, %v74_v33 }
 0x15b   :  { %91 = vperm.xlu1 %142, %v75_v34  }
 0x1d6   :  { %v79_v35 = vpop.permute.xlu1 %78 }
 0x1d7   :  { %v86_v36 = vrot.slane %v79_v35, %v52_v12 }
 0x1d9   :  { %v88_v38 = vmul.f32 %v86_v36, %v32_v0  ;;  %v104_v39 = vmul.f32 %v86_v36, %v34_v1 }
 0x1da   :  { %v92_v37 = vpop.permute.xlu1 %91 }
 0x1db   :  { %v99_v40 = vrot.slane %v92_v37, %v52_v12 }
 0x1dd   :  { %v101_v41 = vadd.f32 %v99_v40, %v88_v38  ;;  %v105_v42 = vadd.f32 %v104_v39, %v99_v40 }
 0x1df   :  { %102 = vst [vmem:[#allocation5] sm:$0xff] %v101_v41  ;;  %107 = vst [vmem:[#allocation5 + $0x8] sm:$0xff] %v105_v42 }
 0x1e0   :  { %179 = shalt.err (!%p176_p12)
}
 0x1e1   :  { %s180_s15 = scalar_lea.hbm %s281_s3, 256 }
 0x1e2   :  { %p181_p13 = scmp.ne.s32.totalorder %s281_s3, %s180_s15  ;;  %p184_p0 = scmp.lt.u32.totalorder %s180_s15, %s281_s3 }
 0x1e4   :  { %p186_p1 = pnand %p184_p0, %p181_p13 }
 0x1e6   :  { %189 = shalt.err (!%p186_p1)
}
 0x1e7   :  { %122 = dma.vmem_to_hbm [thread:$0]  %s117_s5, 256, %s281_s3, [#allocation4], %s195_s28, %s195_s28, %s196_s29  }
 0x1e8   :  { %192 = dma.done.wait [#allocation4], 256  }
 0x1e9   :  { %193 = vsyncadd [#allocation4], 4294967040 }
 0x1ea   :  { %134 = vsyncpa [#allocation3], 1 }
 0x1eb   :  { %135 = vsyncpa [#allocation4], 1 }

</bundles_post_ra>
